<compile_context>
chip_gen: v7x
topology: tpu7x:2x2x1
jax: 0.10.0
libtpu: 0.0.40
codegen_flags: <defaults>
</compile_context>

<pallas_src>
import jax
import jax.numpy as jnp
from jax import lax
from jax.experimental import pallas as pl
from jax.experimental.pallas import tpu as pltpu


_IN_FEATURES = 16
_HIDDEN = 30
_OUT_FEATURES = 1

# Max rows per batch tile.  The x block (tile_b, 16) is lane-padded to
# (tile_b, 128) in VMEM -> tile_b * 512 B per buffer.  8192 rows = 4 MiB per
# buffer, 8 MiB double-buffered: fits every generation's scoped VMEM.
_MAX_TILE_B = 8192


def _cdiv(a, b):
    return -(-a // b)


def _choose_tile_b(batch):
    """Pick the batch tile so that:
         * tile_b is a multiple of 128 (lane-dense output stores),
         * padding waste is bounded by < 128 rows per tile,
         * the tile count is even for small/medium batches (v7x 2-TC balance),
         * per-buffer VMEM stays <= _MAX_TILE_B rows (v5e scoped-VMEM safe).
       For very large batches the tile count is large, so a possible +/-1 tile
       imbalance across the two v7x TensorCores is negligible.
    """
    chunks = _cdiv(batch, 128)                # batch measured in 128-row units
    if chunks <= 1:
        return 128
    max_cpt = _MAX_TILE_B // 128
    n_tiles = max(2, _cdiv(chunks, max_cpt))  # smallest tile count that fits VMEM cap
    if n_tiles % 2:
        n_tiles += 1                          # even -> balanced across 2 TCs
    return 128 * _cdiv(chunks, n_tiles)


def mlp_kernel(x_ref, w1_ref, b1_ref, w2_ref, b2_ref, ot_ref):
    # x_ref : (TILE_B, 16)  native batch-major layout straight from HBM
    # w1_ref: (30, 16)      PyTorch (out, in) layout
    # b1_ref: (30, 1)
    # w2_ref: (1, 30)
    # b2_ref: (1, 1)
    # ot_ref: (1, TILE_B)   lane-dense output (batch on lanes)
    hp = lax.Precision.HIGHEST
    # h = W1 @ x^T without materializing x^T: contract both size-16 feature axes.
    h = lax.dot_general(
        w1_ref[...], x_ref[...],
        dimension_numbers=(((1,), (1,)), ((), ())),
        precision=hp,
        preferred_element_type=jnp.float32,
    )                                                    # (30, TILE_B)  MXU
    h = jnp.maximum(h + b1_ref[...], 0.0)                # bias + ReLU, full vregs (VPU)
    y = jnp.dot(w2_ref[...], h, precision=hp,
                preferred_element_type=jnp.float32) + b2_ref[...]   # (1, TILE_B)
    ot_ref[...] = y.astype(ot_ref.dtype)                 # unmasked lane-dense stores


def net_forward(x, w1, b1, w2, b2, *, tile_b=None):
    """x: (B, 16) f32 -> (B, 1) f32.  Params in PyTorch nn.Linear convention:
       w1: (30, 16), b1: (30,), w2: (1, 30), b2: (1,).
    """
    batch, f_in = x.shape
    hidden = w1.shape[0]

    if tile_b is None:
        tile_b = _choose_tile_b(batch)
    n_tiles = _cdiv(batch, tile_b)

    b1c = b1.reshape(hidden, 1).astype(jnp.float32)
    b2c = b2.reshape(1, 1).astype(jnp.float32)

    cost = pl.CostEstimate(
        flops=2 * n_tiles * tile_b * (f_in * hidden + hidden * _OUT_FEATURES),
        transcendentals=0,
        bytes_accessed=4 * (batch * f_in + batch * _OUT_FEATURES
                            + hidden * f_in + hidden + hidden + 1),
    )

    yt = pl.pallas_call(
        mlp_kernel,
        out_shape=jax.ShapeDtypeStruct((_OUT_FEATURES, batch), jnp.float32),
        grid=(n_tiles,),
        in_specs=[
            # x streamed in native (B, 16) layout; ragged last tile handled by
            # Pallas boundary-block masking (no wrapper transpose / padding pass).
            pl.BlockSpec((tile_b, f_in), lambda i: (i, 0)),
            pl.BlockSpec((hidden, f_in), lambda i: (0, 0)),   # W1 (VMEM-resident)
            pl.BlockSpec((hidden, 1), lambda i: (0, 0)),      # b1
            pl.BlockSpec((_OUT_FEATURES, hidden), lambda i: (0, 0)),  # W2
            pl.BlockSpec((_OUT_FEATURES, 1), lambda i: (0, 0)),       # b2
        ],
        out_specs=pl.BlockSpec((_OUT_FEATURES, tile_b), lambda i: (0, i)),
        compiler_params=pltpu.CompilerParams(
            dimension_semantics=("parallel",),     # batch tiles split across v7x's 2 TCs
            vmem_limit_bytes=32 * 1024 * 1024,     # headroom on v5e; <= physical everywhere
        ),
        cost_estimate=cost,
    )(x.astype(jnp.float32), w1.astype(jnp.float32), b1c, w2.astype(jnp.float32), b2c)

    # (1, B) lane-dense result -> PyTorch (B, 1) layout (tiny reshape, no transpose).
    return yt.reshape(batch, 1)


def init_params(key):
    """nn.Linear-style U(-1/sqrt(fan_in), +1/sqrt(fan_in)) init, PyTorch shapes."""
    k1, k2, k3, k4 = jax.random.split(key, 4)
    bound1 = 1.0 / jnp.sqrt(float(_IN_FEATURES))
    bound2 = 1.0 / jnp.sqrt(float(_HIDDEN))
    w1 = jax.random.uniform(k1, (_HIDDEN, _IN_FEATURES), jnp.float32, -bound1, bound1)
    b1 = jax.random.uniform(k2, (_HIDDEN,), jnp.float32, -bound1, bound1)
    w2 = jax.random.uniform(k3, (_OUT_FEATURES, _HIDDEN), jnp.float32, -bound2, bound2)
    b2 = jax.random.uniform(k4, (_OUT_FEATURES,), jnp.float32, -bound2, bound2)
    return w1, b1, w2, b2


def _reference(x, w1, b1, w2, b2):
    hp = lax.Precision.HIGHEST
    h = jnp.maximum(jnp.dot(x, w1.T, precision=hp) + b1, 0.0)
    return jnp.dot(h, w2.T, precision=hp) + b2


if __name__ == "__main__":
    key = jax.random.PRNGKey(0)
    kx, kx2, kp = jax.random.split(key, 3)
    w1, b1, w2, b2 = init_params(kp)

    # Small shape consistent with the module: (batch=8, 16).
    batch = 8
    x = jax.random.normal(kx, (batch, _IN_FEATURES), jnp.float32)
    out = jax.block_until_ready(net_forward(x, w1, b1, w2, b2))
    ref = _reference(x, w1, b1, w2, b2)
    assert out.shape == (batch, 1)
    assert jnp.allclose(out, ref, atol=1e-4, rtol=1e-4)

    # Ragged batch over multiple tiles: exercises boundary-block masking on both
    # the (tile_b, 16) input and the (1, tile_b) output, plus the auto tile rule
    # (B=300 -> 2 tiles of 256) and an explicit-tile path (3 tiles of 128).
    batch2 = 300
    x2 = jax.random.normal(kx2, (batch2, _IN_FEATURES), jnp.float32)
    ref2 = _reference(x2, w1, b1, w2, b2)
    out2 = jax.block_until_ready(net_forward(x2, w1, b1, w2, b2))               # auto tiles
    out3 = jax.block_until_ready(net_forward(x2, w1, b1, w2, b2, tile_b=128))   # 3 tiles
    assert out2.shape == (batch2, 1) and out3.shape == (batch2, 1)
    assert jnp.allclose(out2, ref2, atol=1e-4, rtol=1e-4)
    assert jnp.allclose(out3, ref2, atol=1e-4, rtol=1e-4)

    print("KERNEL_OK")
</pallas_src>

<mosaic_0001>
module attributes {stable_mosaic.version = 11 : i64} {
  func.func @mlp_kernel(%arg0: i32, %arg1: memref<128x16xf32, #tpu.memory_space<vmem>>, %arg2: memref<30x16xf32, #tpu.memory_space<vmem>>, %arg3: memref<30x1xf32, #tpu.memory_space<vmem>>, %arg4: memref<1x30xf32, #tpu.memory_space<vmem>>, %arg5: memref<1x1xf32, #tpu.memory_space<vmem>>, %arg6: memref<1x128xf32, #tpu.memory_space<vmem>>) attributes {dimension_semantics = [#tpu.dimension_semantics<parallel>], iteration_bounds = array<i64: 1>, scalar_prefetch = 0 : i64, scratch_operands = 0 : i64, tpu.core_type = #tpu.core_type<tc>, window_params = [{transform_indices = @transform_0, window_bounds = array<i64: 128, 16>}, {pipeline_mode = #tpu.pipeline_mode<synchronous>, transform_indices = @transform_1, window_bounds = array<i64: 30, 16>}, {pipeline_mode = #tpu.pipeline_mode<synchronous>, transform_indices = @transform_2, window_bounds = array<i64: 30, 1>}, {pipeline_mode = #tpu.pipeline_mode<synchronous>, transform_indices = @transform_3, window_bounds = array<i64: 1, 30>}, {pipeline_mode = #tpu.pipeline_mode<synchronous>, transform_indices = @transform_4, window_bounds = array<i64: 1, 1>}, {transform_indices = @transform_5, window_bounds = array<i64: 1, 128>}]} {
    %c0 = arith.constant 0 : index
    %c0_0 = arith.constant 0 : index
    %0 = vector.load %arg2[%c0, %c0_0] : memref<30x16xf32, #tpu.memory_space<vmem>>, vector<30x16xf32>
    %c0_1 = arith.constant 0 : index
    %c0_2 = arith.constant 0 : index
    %1 = vector.load %arg1[%c0_1, %c0_2] : memref<128x16xf32, #tpu.memory_space<vmem>>, vector<128x16xf32>
    %cst = arith.constant dense<0.000000e+00> : vector<30x128xf32>
    %2 = tpu.matmul %0, %1, %cst {dimension_numbers = #tpu.dot_dimension_numbers<[1], [1], [0], [0], [0, 0, 1, 0], [], []>, precision = #tpu.contract_precision<fp32>} : vector<30x16xf32>, vector<128x16xf32>, vector<30x128xf32> -> vector<30x128xf32>
    %c0_3 = arith.constant 0 : index
    %c0_4 = arith.constant 0 : index
    %3 = vector.load %arg3[%c0_3, %c0_4] : memref<30x1xf32, #tpu.memory_space<vmem>>, vector<30x1xf32>
    %4 = vector.broadcast %3 : vector<30x1xf32> to vector<30x128xf32>
    %5 = arith.addf %2, %4 : vector<30x128xf32>
    %cst_5 = arith.constant 0.000000e+00 : f32
    %6 = vector.broadcast %cst_5 : f32 to vector<30x128xf32>
    %7 = arith.maximumf %5, %6 : vector<30x128xf32>
    %c0_6 = arith.constant 0 : index
    %c0_7 = arith.constant 0 : index
    %8 = vector.load %arg4[%c0_6, %c0_7] : memref<1x30xf32, #tpu.memory_space<vmem>>, vector<1x30xf32>
    %cst_8 = arith.constant dense<0.000000e+00> : vector<1x128xf32>
    %9 = tpu.matmul %8, %7, %cst_8 {dimension_numbers = #tpu.dot_dimension_numbers<[1], [0], [0], [1], [0, 0, 1, 1], [], []>, precision = #tpu.contract_precision<fp32>} : vector<1x30xf32>, vector<30x128xf32>, vector<1x128xf32> -> vector<1x128xf32>
    %c0_9 = arith.constant 0 : index
    %c0_10 = arith.constant 0 : index
    %10 = vector.load %arg5[%c0_9, %c0_10] : memref<1x1xf32, #tpu.memory_space<vmem>>, vector<1x1xf32>
    %11 = vector.broadcast %10 : vector<1x1xf32> to vector<1x128xf32>
    %12 = arith.addf %9, %11 : vector<1x128xf32>
    %c0_11 = arith.constant 0 : index
    %c0_12 = arith.constant 0 : index
    %13 = vector.load %arg6[%c0_11, %c0_12] : memref<1x128xf32, #tpu.memory_space<vmem>>, vector<1x128xf32>
    tpu.vector_store %arg6[%c0_11, %c0_12], %12 {strides = array<i32>} : memref<1x128xf32, #tpu.memory_space<vmem>>, vector<1x128xf32>,
    return
  }
  func.func @transform_0(%arg0: i32) -> (i32, i32) {
    %c0_i32 = arith.constant 0 : i32
    %c0_i32_0 = arith.constant 0 : i32
    return %arg0, %c0_i32 : i32, i32
  }
  func.func @transform_1(%arg0: i32) -> (i32, i32) {
    %c0_i32 = arith.constant 0 : i32
    %c0_i32_0 = arith.constant 0 : i32
    %c0_i32_1 = arith.constant 0 : i32
    return %c0_i32, %c0_i32_0 : i32, i32
  }
  func.func @transform_2(%arg0: i32) -> (i32, i32) {
    %c0_i32 = arith.constant 0 : i32
    %c0_i32_0 = arith.constant 0 : i32
    %c0_i32_1 = arith.constant 0 : i32
    return %c0_i32, %c0_i32_0 : i32, i32
  }
  func.func @transform_3(%arg0: i32) -> (i32, i32) {
    %c0_i32 = arith.constant 0 : i32
    %c0_i32_0 = arith.constant 0 : i32
    %c0_i32_1 = arith.constant 0 : i32
    return %c0_i32, %c0_i32_0 : i32, i32
  }
  func.func @transform_4(%arg0: i32) -> (i32, i32) {
    %c0_i32 = arith.constant 0 : i32
    %c0_i32_0 = arith.constant 0 : i32
    %c0_i32_1 = arith.constant 0 : i32
    return %c0_i32, %c0_i32_0 : i32, i32
  }
  func.func @transform_5(%arg0: i32) -> (i32, i32) {
    %c0_i32 = arith.constant 0 : i32
    %c0_i32_0 = arith.constant 0 : i32
    return %c0_i32, %arg0 : i32, i32
  }
}

</mosaic_0001>

<bundles_post_ra>
// kernel: tpu_custom_call.1
= control target key start
LH: loop header
LB: loop body
LE: loop exit
PB: predicated region body
PF: predicated region fallthrough
CT: control target
= control target key end

     0   :  { %s2574_s0 = inlined_call_operand.vmem [shape: f32[8,16], index: 0, kind: input, shape index: {}]   ;;  %s2575_s1 = inlined_call_operand.vmem [shape: f32[30,16], index: 1, kind: input, shape index: {}]   ;;  %s2576_s2 = inlined_call_operand.vmem [shape: f32[30,1], index: 2, kind: input, shape index: {}]   ;;  %s2577_s3 = inlined_call_operand.vmem [shape: f32[1,30], index: 3, kind: input, shape index: {}]   ;;  %s2578_s4 = inlined_call_operand.<no memory space> [shape: f32[1,1], index: 4, kind: input, shape index: {}]   ;;  %s2579_s5 = inlined_call_operand.hbm [shape: f32[1,8], index: 5, kind: output, shape index: {}]  }
   0x1   :  { %v10_v0 = vstv %s2578_s4 }
   0x2   :  { %11 = vst [vmem:[#allocation2] sm:$0x1] %v10_v0 }
   0x3   :  { %v27_v1 = vld [vmem:[%s2574_s0] sm:$0xff]  ;;  %v28_v2 = vld [vmem:[%s2574_s0 + $0x8] sm:$0xff]  ;;  %vm67_vm0 = vcmask 130048   ;;  %v29_v3 = vld [vmem:[%s2574_s0 + $0x10] sm:$0xff] }
   0x4   :  { %v2206_v4 = vsel %vm67_vm0, %v27_v1, 0  ;;  %v2209_v5 = vsel %vm67_vm0, %v28_v2, 0  ;;  %v30_v6 = vld [vmem:[%s2574_s0 + $0x18] sm:$0xff]  ;;  %v2215_v7 = vsel %vm67_vm0, %v29_v3, 0  ;;  %v31_v12 = vld [vmem:[%s2574_s0 + $0x20] sm:$0xff]  ;;  %v32_v13 = vld [vmem:[%s2574_s0 + $0x28] sm:$0xff] }
   0x5   :  { %v129_v8 = vand.u32 4294901760, %v2206_v4  ;;  %v132_v9 = vand.u32 4294901760, %v2209_v5  ;;  %v2220_v10 = vsel %vm67_vm0, %v30_v6, 0  ;;  %v135_v11 = vand.u32 4294901760, %v2215_v7  ;;  %v23_v19 = vld [vmem:[%s2575_s1] sm:$0xff] }
   0x6   :  { %v138_v14 = vand.u32 4294901760, %v2220_v10  ;;  %v93_v17 = vsel %vm67_vm0, %v31_v12, 0  ;;  %v96_v18 = vsel %vm67_vm0, %v32_v13, 0 }
   0x7   :  { %v2230_v15 = vpack.c.bf16 %v132_v9, %v129_v8  ;;  %v141_v20 = vand.u32 4294901760, %v93_v17  ;;  %v144_v21 = vand.u32 4294901760, %v96_v18 }
   0x8   :  { %v2232_v16 = vpack.c.bf16 %v138_v14, %v135_v11 }
   0x9   :  { %1866 = vmatprep.subr.bf16.mxu1 %v2230_v15  ;;  %1962 = vmatprep.subr.bf16.mxu0 %v2230_v15 }
   0xa   :  { %1868 = vmatpush3.bf16.xpose.msra.mxu1 %v2230_v15  ;;  %1964 = vmatpush3.bf16.xpose.msra.mxu0 %v2230_v15 }
   0xb   :  { %1870 = vmatprep.subr.bf16.mxu1 %v2232_v16  ;;  %1966 = vmatprep.subr.bf16.mxu0 %v2232_v16 }
   0xc   :  { %12 = vsyncpa [#allocation4], 0  ;;  %v33_v22 = vld [vmem:[%s2574_s0 + $0x30] sm:$0xff]  ;;  %v34_v23 = vld [vmem:[%s2574_s0 + $0x38] sm:$0xff]  ;;  %v69_v24 = vsel %vm67_vm0, %v23_v19, 0  ;;  %v2254_v26 = vpack.c.bf16 %v144_v21, %v141_v20  ;;  %v2296_v49 = vsub.f32 %v2206_v4, %v129_v8  ;;  %v2299_v50 = vsub.f32 %v2209_v5, %v132_v9 }
   0xd   :  { %v2252_v25 = vand.u32 4294901760, %v69_v24  ;;  %v99_v27 = vsel %vm67_vm0, %v33_v22, 0  ;;  %v102_v28 = vsel %vm67_vm0, %v34_v23, 0  ;;  %v35_v34 = vld [vmem:[%s2574_s0 + $0x40] sm:$0xff]  ;;  %v36_v35 = vld [vmem:[%s2574_s0 + $0x48] sm:$0xff]  ;;  %v37_v42 = vld [vmem:[%s2574_s0 + $0x50] sm:$0xff]  ;;  %v2305_v52 = vsub.f32 %v2215_v7, %v135_v11 }
   0xe   :  { %v147_v31 = vand.u32 4294901760, %v99_v27  ;;  %v150_v32 = vand.u32 4294901760, %v102_v28  ;;  %v105_v38 = vsel %vm67_vm0, %v35_v34, 0  ;;  %v108_v39 = vsel %vm67_vm0, %v36_v35, 0  ;;  %v38_v43 = vld [vmem:[%s2574_s0 + $0x58] sm:$0xff]  ;;  %v39_v51 = vld [vmem:[%s2574_s0 + $0x60] sm:$0xff] }
   0xf   :  { %v2259_v29 = vsub.f32 %v69_v24, %v2252_v25  ;;  %v153_v40 = vand.u32 4294901760, %v105_v38  ;;  %v156_v41 = vand.u32 4294901760, %v108_v39  ;;  %v111_v45 = vsel %vm67_vm0, %v37_v42, 0  ;;  %v40_v56 = vld [vmem:[%s2574_s0 + $0x68] sm:$0xff]  ;;  %v42_v11 = vld [vmem:[%s2574_s0 + $0x78] sm:$0xff] }
  0x10   :  { %v2273_v37 = vpack.c.bf16 %v150_v32, %v147_v31  ;;  %v114_v46 = vsel %vm67_vm0, %v38_v43, 0  ;;  %v159_v47 = vand.u32 4294901760, %v111_v45  ;;  %v2308_v53 = vsub.f32 %v2220_v10, %v138_v14  ;;  %v41_v10 = vld [vmem:[%s2574_s0 + $0x70] sm:$0xff]  ;;  %v24_v13 = vld [vmem:[%s2575_s1 + $0x8] sm:$0xff] }
  0x11   :  { %v211_v30 = vand.u32 4294901760, %v2259_v29  ;;  %v2287_v44 = vpack.c.bf16 %v156_v41, %v153_v40  ;;  %v162_v48 = vand.u32 4294901760, %v114_v46  ;;  %v2310_v54 = vsub.f32 %v93_v17, %v141_v20 }
  0x12   :  { %1872 = vmatpush3.bf16.xpose.msra.mxu1 %v2232_v16  ;;  %1968 = vmatpush3.bf16.xpose.msra.mxu0 %v2232_v16  ;;  %v2312_v55 = vsub.f32 %v96_v18, %v144_v21  ;;  %v2317_v57 = vsub.f32 %v99_v27, %v147_v31  ;;  %v2319_v58 = vsub.f32 %v102_v28, %v150_v32  ;;  %v117_v1 = vsel %vm67_vm0, %v39_v51, 0  ;;  %v25_v21 = vld [vmem:[%s2575_s1 + $0x10] sm:$0xff] }
  0x13   :  { %1874 = vmatprep.subr.bf16.mxu1 %v2254_v26  ;;  %1970 = vmatprep.subr.bf16.mxu0 %v2254_v26  ;;  %v212_v33 = vsub.f32 %v2259_v29, %v211_v30  ;;  %v2323_v59 = vpack.c.bf16 %v2299_v50, %v2296_v49  ;;  %v2325_v60 = vsub.f32 %v105_v38, %v153_v40  ;;  %v120_v3 = vsel %vm67_vm0, %v40_v56, 0 }
  0x14   :  { %1717 = vmatprep.mubr.f32.mxu0 %v211_v30  ;;  %v2327_v61 = vsub.f32 %v108_v39, %v156_v41  ;;  %v2331_v62 = vpack.c.bf16 %v2308_v53, %v2305_v52  ;;  %v2335_v63 = vpack.c.bf16 %v2312_v55, %v2310_v54  ;;  %v2337_v0 = vpack.c.bf16 %v162_v48, %v159_v47  ;;  %v26_v30 = vld [vmem:[%s2575_s1 + $0x18] sm:$0x3f] }
  0x15   :  { %v213_v36 = vand.u32 4294901760, %v212_v33  ;;  %v2342_v2 = vpack.c.bf16 %v2319_v58, %v2317_v57  ;;  %v2345_v4 = vsub.f32 %v111_v45, %v159_v47  ;;  %v2347_v5 = vsub.f32 %v114_v46, %v162_v48 }
  0x16   :  { %v2351_v6 = vpack.c.bf16 %v2327_v61, %v2325_v60  ;;  %v165_v8 = vand.u32 4294901760, %v117_v1  ;;  %v168_v9 = vand.u32 4294901760, %v120_v3  ;;  %v123_v14 = vsel %vm67_vm0, %v41_v10, 0 }
  0x17   :  { %1603 = vmatprep.mubr.f32.mxu1 %v213_v36  ;;  %v2357_v7 = vpack.c.bf16 %v2347_v5, %v2345_v4  ;;  %v126_v17 = vsel %vm67_vm0, %v42_v11, 0  ;;  %v72_v20 = vsel %vm67_vm0, %v24_v13, 0  ;;  %v171_v23 = vand.u32 4294901760, %v123_v14 }
  0x18   :  { %v2367_v12 = vpack.c.bf16 %v168_v9, %v165_v8  ;;  %v2374_v18 = vsub.f32 %v117_v1, %v165_v8  ;;  %v2376_v19 = vsub.f32 %v120_v3, %v168_v9  ;;  %v174_v24 = vand.u32 4294901760, %v126_v17 }
  0x19   :  { %v252_v27 = vand.u32 4294901760, %v2296_v49  ;;  %v259_v28 = vand.u32 4294901760, %v2299_v50  ;;  %v2395_v31 = vand.u32 4294901760, %v72_v20  ;;  %v75_v32 = vsel %vm67_vm0, %v25_v21, 0 }
  0x1a   :  { %1876 = vmatpush3.bf16.xpose.msra.mxu1 %v2254_v26  ;;  %1972 = vmatpush3.bf16.xpose.msra.mxu0 %v2254_v26  ;;  %v2386_v22 = vpack.c.bf16 %v2376_v19, %v2374_v18  ;;  %v78_v33 = vsel %vm67_vm0, %v26_v30, 0  ;;  %v2399_v34 = vpack.c.bf16 %v174_v24, %v171_v23  ;;  %v2403_v38 = vsub.f32 %v123_v14, %v171_v23 }
  0x1b   :  { %1878 = vmatprep.subr.bf16.mxu1 %v2273_v37  ;;  %1974 = vmatprep.subr.bf16.mxu0 %v2273_v37  ;;  %v253_v35 = vsub.f32 %v2296_v49, %v252_v27  ;;  %v260_v36 = vsub.f32 %v2299_v50, %v259_v28  ;;  %v2405_v39 = vsub.f32 %v126_v17, %v174_v24  ;;  %v2407_v40 = vand.u32 4294901760, %v75_v32 }
  0x1c   :  { %v2410_v41 = vsub.f32 %v72_v20, %v2395_v31  ;;  %v2412_v42 = vand.u32 4294901760, %v78_v33  ;;  %v266_v47 = vand.u32 4294901760, %v2305_v52  ;;  %v273_v48 = vand.u32 4294901760, %v2308_v53 }
  0x1d   :  { %v2418_v43 = vpack.c.bf16 %v2405_v39, %v2403_v38  ;;  %v254_v45 = vand.u32 4294901760, %v253_v35  ;;  %v261_v46 = vand.u32 4294901760, %v260_v36  ;;  %v2425_v49 = vsub.f32 %v75_v32, %v2407_v40 }
  0x1e   :  { %v221_v50 = vand.u32 4294901760, %v2410_v41  ;;  %v2429_v51 = vsub.f32 %v78_v33, %v2412_v42  ;;  %v1993_v1 = vpack.c.bf16 %v259_v28, %v252_v27  ;;  %v267_v3 = vsub.f32 %v2305_v52, %v266_v47 }
  0x1f   :  { %v1897_v56 = vpack.c.bf16 %v261_v46, %v254_v45  ;;  %v274_v8 = vsub.f32 %v2308_v53, %v273_v48  ;;  %v231_v9 = vand.u32 4294901760, %v2425_v49  ;;  %v280_v17 = vand.u32 4294901760, %v2310_v54 }
  0x20   :  { %v222_v10 = vsub.f32 %v2410_v41, %v221_v50  ;;  %v241_v11 = vand.u32 4294901760, %v2429_v51  ;;  %v268_v13 = vand.u32 4294901760, %v267_v3  ;;  %v287_v52 = vand.u32 4294901760, %v2312_v55  ;;  %v45_v3 = vld [vmem:[%s2576_s2 + $0x10] sm:$0xff] }
  0x21   :  { %v275_v14 = vand.u32 4294901760, %v274_v8  ;;  %v232_v53 = vsub.f32 %v2425_v49, %v231_v9  ;;  %v1997_v24 = vpack.c.bf16 %v273_v48, %v266_v47  ;;  %v281_v27 = vsub.f32 %v2310_v54, %v280_v17  ;;  %v43_v54 = vld [vmem:[%s2576_s2] sm:$0xff] }
  0x22   :  { %1880 = vmatpush3.bf16.xpose.msra.mxu1 %v2273_v37  ;;  %1976 = vmatpush3.bf16.xpose.msra.mxu0 %v2273_v37  ;;  %v223_v20 = vand.u32 4294901760, %v222_v10  ;;  %v242_v21 = vsub.f32 %v2429_v51, %v241_v11  ;;  %v288_v28 = vsub.f32 %v2312_v55, %v287_v52  ;;  %v294_v36 = vand.u32 4294901760, %v2317_v57  ;;  %v46_v55 = vld [vmem:[%s2576_s2 + $0x18] sm:$0x3f]  ;;  %v903_v10 = vld [vmem:[#allocation2] sm:$0x1] }
  0x23   :  { %1882 = vmatprep.subr.bf16.mxu1 %v2287_v44  ;;  %1978 = vmatprep.subr.bf16.mxu0 %v2287_v44  ;;  %v1901_v23 = vpack.c.bf16 %v275_v14, %v268_v13  ;;  %v233_v30 = vand.u32 4294901760, %v232_v53  ;;  %v282_v33 = vand.u32 4294901760, %v281_v27  ;;  %v301_v45 = vand.u32 4294901760, %v2319_v58 }
  0x24   :  { %v243_v32 = vand.u32 4294901760, %v242_v21  ;;  %v289_v35 = vand.u32 4294901760, %v288_v28  ;;  %v2001_v46 = vpack.c.bf16 %v287_v52, %v280_v17  ;;  %v295_v48 = vsub.f32 %v2317_v57, %v294_v36 }
  0x25   :  { %v2005_v13 = vpack.c.bf16 %v301_v45, %v294_v36  ;;  %v329_v21 = vand.u32 4294901760, %v2347_v5  ;;  %vm2160_vm1 = vmmov 0   ;;  %vm913_vm2 = vcmask 244736  }
  0x26   :  { %v1905_v47 = vpack.c.bf16 %v289_v35, %v282_v33  ;;  %v296_v57 = vand.u32 4294901760, %v295_v48  ;;  %vm917_vm3 = vcmask 1045504  }
  0x27   :  { %v330_v28 = vsub.f32 %v2347_v5, %v329_v21 }
  0x2a   :  { %1884 = vmatpush3.bf16.xpose.msra.mxu1 %v2287_v44  ;;  %1980 = vmatpush3.bf16.xpose.msra.mxu0 %v2287_v44 }
  0x2b   :  { %1886 = vmatprep.subr.bf16.mxu1 %v2337_v0  ;;  %1982 = vmatprep.subr.bf16.mxu0 %v2337_v0 }
  0x32   :  { %1888 = vmatpush3.bf16.xpose.msra.mxu1 %v2337_v0  ;;  %1984 = vmatpush3.bf16.xpose.msra.mxu0 %v2337_v0 }
  0x33   :  { %1890 = vmatprep.subr.bf16.mxu1 %v2367_v12  ;;  %1986 = vmatprep.subr.bf16.mxu0 %v2367_v12 }
  0x3a   :  { %1892 = vmatpush3.bf16.xpose.msra.mxu1 %v2367_v12  ;;  %1988 = vmatpush3.bf16.xpose.msra.mxu0 %v2367_v12 }
  0x3b   :  { %1894 = vmatprep.subr.bf16.mxu1 %v2399_v34  ;;  %1990 = vmatprep.subr.bf16.mxu0 %v2399_v34 }
  0x42   :  { %1896 = vmatpush3.bf16.xpose.msra.mxu1 %v2399_v34  ;;  %1992 = vmatpush3.bf16.xpose.msra.mxu0 %v2399_v34 }
  0x43   :  { %1898 = vmatprep.subr.bf16.mxu1 %v1897_v56  ;;  %1994 = vmatprep.subr.bf16.mxu0 %v1993_v1 }
  0x49   :  { %1604 = vmatmul.mubr.f32.vlgmr.msra.gmra.mrb[0].mxu1 %v223_v20  ;;  %1718 = vmatmul.mubr.f32.vlgmr.msra.gmra.mrb[0].mxu0 %v221_v50  ;;  %v302_v50 = vsub.f32 %v2319_v58, %v301_v45  ;;  %v308_v58 = vand.u32 4294901760, %v2325_v60  ;;  %v322_v20 = vand.u32 4294901760, %v2345_v4 }
  0x4a   :  { %1900 = vmatpush3.bf16.xpose.msra.mxu1 %v1897_v56  ;;  %1996 = vmatpush3.bf16.xpose.msra.mxu0 %v1993_v1  ;;  %v2158_v56 = vmov 0   ;;  %v44_v1 = vld [vmem:[%s2576_s2 + $0x8] sm:$0xff] }
  0x4b   :  { %1902 = vmatprep.subr.bf16.mxu1 %v1901_v23  ;;  %1998 = vmatprep.subr.bf16.mxu0 %v1997_v24  ;;  %v303_v8 = vand.u32 4294901760, %v302_v50  ;;  %v309_v14 = vsub.f32 %v2325_v60, %v308_v58  ;;  %v323_v27 = vsub.f32 %v2345_v4, %v322_v20  ;;  %v2013_v35 = vpack.c.bf16 %v329_v21, %v322_v20 }
  0x4c   :  { %1606 = vmatprep.mubr.f32.mxu1 %v233_v30  ;;  %1720 = vmatprep.mubr.f32.mxu0 %v231_v9  ;;  %v315_v9 = vand.u32 4294901760, %v2327_v61  ;;  %v336_v30 = vand.u32 4294901760, %v2374_v18 }
  0x4d   :  { %1607 = vmatmul.mubr.f32.gmra.mrb[2].mxu1 %v243_v32  ;;  %1721 = vmatmul.mubr.f32.gmra.mrb[2].mxu0 %v241_v11  ;;  %v1909_v11 = vpack.c.bf16 %v303_v8, %v296_v57  ;;  %v310_v52 = vand.u32 4294901760, %v309_v14  ;;  %v324_v60 = vand.u32 4294901760, %v323_v27  ;;  %v343_v32 = vand.u32 4294901760, %v2376_v19 }
  0x4e   :  { %1641 = vmatprep.mubr.f32.mxu1 %v2252_v25  ;;  %1755 = vmatprep.mubr.f32.mxu0 %v2252_v25  ;;  %v316_v17 = vsub.f32 %v2327_v61, %v315_v9  ;;  %v331_v61 = vand.u32 4294901760, %v330_v28  ;;  %v337_v36 = vsub.f32 %v2374_v18, %v336_v30 }
  0x4f   :  { %2132 = vset.pattern.permute.xlu0 %v2158_v56  ;;  %2133 = vset.pattern.permute.xlu1 %v2158_v56  ;;  %v344_v45 = vsub.f32 %v2376_v19, %v343_v32 }
  0x50   :  { %49 = vperm.xlu0 %2132, %v43_v54   ;;  %64 = vperm.xlu1 %2133, %v46_v55   ;;  %v317_v53 = vand.u32 4294901760, %v316_v17  ;;  %v1917_v33 = vpack.c.bf16 %v331_v61, %v324_v60  ;;  %v338_v4 = vand.u32 4294901760, %v337_v36  ;;  %v350_v54 = vand.u32 4294901760, %v2403_v38 }
  0x51   :  { %v345_v5 = vand.u32 4294901760, %v344_v45  ;;  %v357_v55 = vand.u32 4294901760, %v2405_v39 }
  0x52   :  { %1904 = vmatpush3.bf16.xpose.msra.mxu1 %v1901_v23  ;;  %2000 = vmatpush3.bf16.xpose.msra.mxu0 %v1997_v24  ;;  %v1913_v23 = vpack.c.bf16 %v317_v53, %v310_v52  ;;  %v2009_v24 = vpack.c.bf16 %v315_v9, %v308_v58  ;;  %v351_v48 = vsub.f32 %v2403_v38, %v350_v54 }
  0x53   :  { %1906 = vmatprep.subr.bf16.mxu1 %v1905_v47  ;;  %2002 = vmatprep.subr.bf16.mxu0 %v2001_v46  ;;  %v358_v50 = vsub.f32 %v2405_v39, %v357_v55 }
  0x54   :  { %54 = vperm.xlu0 %2132, %v44_v1   ;;  %59 = vperm.xlu1 %2133, %v45_v3   ;;  %v352_v18 = vand.u32 4294901760, %v351_v48  ;;  %v2021_v1 = vpack.c.bf16 %v357_v55, %v350_v54 }
  0x55   :  { %v359_v19 = vand.u32 4294901760, %v358_v50 }
  0x57   :  { %v1925_v56 = vpack.c.bf16 %v359_v19, %v352_v18 }
  0x58   :  { %906 = vperm.xlu0 %2132, %v903_v10  }
  0x5a   :  { %1908 = vmatpush3.bf16.xpose.msra.mxu1 %v1905_v47  ;;  %2004 = vmatpush3.bf16.xpose.msra.mxu0 %v2001_v46  ;;  %v1921_v46 = vpack.c.bf16 %v345_v5, %v338_v4  ;;  %v2017_v47 = vpack.c.bf16 %v343_v32, %v336_v30 }
  0x5b   :  { %1910 = vmatprep.subr.bf16.mxu1 %v1909_v11  ;;  %2006 = vmatprep.subr.bf16.mxu0 %v2005_v13 }
  0x62   :  { %1912 = vmatpush3.bf16.xpose.msra.mxu1 %v1909_v11  ;;  %2008 = vmatpush3.bf16.xpose.msra.mxu0 %v2005_v13 }
  0x63   :  { %1914 = vmatprep.subr.bf16.mxu1 %v1913_v23  ;;  %2010 = vmatprep.subr.bf16.mxu0 %v2009_v24 }
  0x6a   :  { %1916 = vmatpush3.bf16.xpose.msra.mxu1 %v1913_v23  ;;  %2012 = vmatpush3.bf16.xpose.msra.mxu0 %v2009_v24 }
  0x6b   :  { %1918 = vmatprep.subr.bf16.mxu1 %v1917_v33  ;;  %2014 = vmatprep.subr.bf16.mxu0 %v2013_v35 }
  0x72   :  { %1920 = vmatpush3.bf16.xpose.msra.mxu1 %v1917_v33  ;;  %2016 = vmatpush3.bf16.xpose.msra.mxu0 %v2013_v35 }
  0x73   :  { %1922 = vmatprep.subr.bf16.mxu1 %v1921_v46  ;;  %2018 = vmatprep.subr.bf16.mxu0 %v2017_v47 }
  0x7a   :  { %1924 = vmatpush3.bf16.xpose.msra.mxu1 %v1921_v46  ;;  %2020 = vmatpush3.bf16.xpose.msra.mxu0 %v2017_v47 }
  0x7b   :  { %1926 = vmatprep.subr.bf16.mxu1 %v1925_v56  ;;  %2022 = vmatprep.subr.bf16.mxu0 %v2021_v1 }
  0x82   :  { %1928 = vmatpush3.bf16.xpose.msra.mxu1 %v1925_v56  ;;  %2024 = vmatpush3.bf16.xpose.msra.mxu0 %v2021_v1  ;;  %v909_v56 = vlaneseq }
  0x83   :  { %1930 = vmatprep.subr.bf16.mxu1 %v2323_v59  ;;  %2026 = vmatprep.subr.bf16.mxu0 %v2230_v15 }
  0x84   :  { %v910_v1 = vshrl.u32 %v909_v56, 7 }
  0x89   :  { %1642 = vmatmul.mubr.f32.vlgmr.msra.gmra.mrb[0].mxu1 %v2395_v31  ;;  %1756 = vmatmul.mubr.f32.vlgmr.msra.gmra.mrb[0].mxu0 %v2395_v31 }
  0x8a   :  { %1932 = vmatpush3.bf16.xpose.msra.mxu1 %v2323_v59  ;;  %2028 = vmatpush3.bf16.xpose.msra.mxu0 %v2230_v15  ;;  %v2159_v15 = vmov 0.0|0.0  }
  0x8b   :  { %1934 = vmatprep.subr.bf16.mxu1 %v2331_v62  ;;  %2030 = vmatprep.subr.bf16.mxu0 %v2232_v16 }
  0x8c   :  { %1644 = vmatprep.mubr.f32.mxu1 %v2407_v40  ;;  %1758 = vmatprep.mubr.f32.mxu0 %v2407_v40 }
  0x8d   :  { %1645 = vmatmul.mubr.f32.gmra.mrb[2].mxu1 %v2412_v42  ;;  %1759 = vmatmul.mubr.f32.gmra.mrb[2].mxu0 %v2412_v42 }
  0x8e   :  { %1679 = vmatprep.mubr.f32.mxu1 %v2259_v29  ;;  %1793 = vmatprep.mubr.f32.mxu0 %v2252_v25 }
  0x92   :  { %1936 = vmatpush3.bf16.xpose.msra.mxu1 %v2331_v62  ;;  %2032 = vmatpush3.bf16.xpose.msra.mxu0 %v2232_v16  ;;  %v2161_v16 = vmov 0.0  }
  0x93   :  { %1938 = vmatprep.subr.bf16.mxu1 %v2335_v63  ;;  %2034 = vmatprep.subr.bf16.mxu0 %v2254_v26 }
  0x9a   :  { %1940 = vmatpush3.bf16.xpose.msra.mxu1 %v2335_v63  ;;  %2036 = vmatpush3.bf16.xpose.msra.mxu0 %v2254_v26  ;;  %v902_v26 = vld [vmem:[%s2577_s3] sm:$0x1]  ;;  %s2162_s3 = smov [#allocation3]  }
  0x9b   :  { %1942 = vmatprep.subr.bf16.mxu1 %v2342_v2  ;;  %2038 = vmatprep.subr.bf16.mxu0 %v2273_v37  ;;  %v915_v29 = vsel %vm913_vm2, %v902_v26, 0  ;;  %s1413_s15 = sshll.u32 %s2162_s3, 4  ;;  %s1414_s15 = int_to_ptr.vmem [resolvable:$true] %s1413_s15 }
  0x9c   :  { %v2533_v59 = vand.u32 4294901760, %v915_v29  ;;  %s2134_s16 = scalar_lea.vmem %s1414_s15, 16  ;;  %s2138_s17 = scalar_lea.vmem %s1414_s15, 32 }
  0x9d   :  { %p2135_p0 = scmp.ne.s32.totalorder %s1414_s15, %s2134_s16  ;;  %p2139_p1 = scmp.lt.s32.totalorder %s1414_s15, %s1414_s15 }
  0x9e   :  { %p2140_p2 = scmp.lt.s32.totalorder %s2138_s17, %s2134_s16 }
  0xa0   :  { %p2141_p3 = por %p2140_p2, %p2139_p1 }
  0xa2   :  { %1944 = vmatpush3.bf16.xpose.msra.mxu1 %v2342_v2  ;;  %2040 = vmatpush3.bf16.xpose.msra.mxu0 %v2273_v37  ;;  %p2142_p4 = pnand %p2141_p3, %p2135_p0 }
  0xa3   :  { %1946 = vmatprep.subr.bf16.mxu1 %v2351_v6  ;;  %2042 = vmatprep.subr.bf16.mxu0 %v2287_v44 }
  0xaa   :  { %1948 = vmatpush3.bf16.xpose.msra.mxu1 %v2351_v6  ;;  %2044 = vmatpush3.bf16.xpose.msra.mxu0 %v2287_v44 }
  0xab   :  { %1950 = vmatprep.subr.bf16.mxu1 %v2357_v7  ;;  %2046 = vmatprep.subr.bf16.mxu0 %v2337_v0 }
  0xb2   :  { %1952 = vmatpush3.bf16.xpose.msra.mxu1 %v2357_v7  ;;  %2048 = vmatpush3.bf16.xpose.msra.mxu0 %v2337_v0 }
  0xb3   :  { %1954 = vmatprep.subr.bf16.mxu1 %v2386_v22  ;;  %2050 = vmatprep.subr.bf16.mxu0 %v2367_v12 }
  0xba   :  { %1956 = vmatpush3.bf16.xpose.msra.mxu1 %v2386_v22  ;;  %2052 = vmatpush3.bf16.xpose.msra.mxu0 %v2367_v12 }
  0xbb   :  { %1958 = vmatprep.subr.bf16.mxu1 %v2418_v43  ;;  %2054 = vmatprep.subr.bf16.mxu0 %v2399_v34 }
  0xc2   :  { %1960 = vmatpush3.bf16.xpose.msra.mxu1 %v2418_v43  ;;  %2056 = vmatpush3.bf16.xpose.msra.mxu0 %v2399_v34 }
  0xc3   :  { %2057 = vmatprep.subr.bf16.mxu0 %v2159_v15  ;;  %2075 = vmatprep.subr.bf16.mxu1 %v2159_v15 }
  0xc9   :  { %1680 = vmatmul.mubr.f32.vlgmr.msra.gmra.mrb[0].mxu1 %v2410_v41  ;;  %1794 = vmatmul.mubr.f32.vlgmr.msra.gmra.mrb[0].mxu0 %v2395_v31  ;;  %v2536_v31 = vsub.f32 %v915_v29, %v2533_v59 }
  0xca   :  { %1682 = vmatprep.mubr.f32.mxu1 %v2425_v49  ;;  %1796 = vmatprep.mubr.f32.mxu0 %v2407_v40 }
  0xcb   :  { %v992_v8 = vand.u32 4294901760, %v2536_v31 }
  0xcd   :  { %1683 = vmatmul.mubr.f32.gmra.mrb[2].mxu1 %v2429_v51  ;;  %1797 = vmatmul.mubr.f32.gmra.mrb[2].mxu0 %v2412_v42  ;;  %v993_v20 = vsub.f32 %v2536_v31, %v992_v8 }
  0xce   :  { %1807 = vmatprep.mubr.msk.f32.mxu0 %vm2160_vm1, %v2161_v16  ;;  %1840 = vmatprep.mubr.msk.f32.mxu1 %vm2160_vm1, %v2161_v16 }
  0xcf   :  { %v50_v25 = vpop.permute.xlu0 %49  ;;  %v65_v37 = vpop.permute.xlu1 %64  ;;  %v994_v35 = vand.u32 4294901760, %v993_v20 }
  0xd3   :  { %v55_v44 = vpop.permute.xlu0 %54  ;;  %v60_v22 = vpop.permute.xlu1 %59 }
  0xd7   :  { %v907_v26 = vpop.permute.xlu0 %906 }
 0x19c   :  { %v1681_v62 = vpop.f32.mrb[0].mxu1  ;;  %v1795_v63 = vpop.f32.mrb[0].mxu0 }
 0x19d   :  { %v2093_v0 = vadd.f32 %v1681_v62, %v55_v44  ;;  %v518_v2 = vpop.f32.mrb[1].mxu1  ;;  %v876_v6 = vpop.f32.mrb[1].mxu0 }
 0x19e   :  { %v2095_v7 = vadd.f32 %v518_v2, %v50_v25  ;;  %v911_v25 = vsub.s32 0, %v910_v1 }
 0x19f   :  { %v2094_v12 = vadd.f32 %v2093_v0, %v1795_v63 }
 0x1a0   :  { %v2096_v34 = vadd.f32 %v2095_v7, %v876_v6  ;;  %v1684_v38 = vpop.f32.mrb[2].mxu1  ;;  %v1798_v39 = vpop.f32.mrb[2].mxu0  ;;  %v912_v29 = vrot.slane %v907_v26, %v911_v25 }
 0x1a1   :  { %v899_v40 = vmax.f32 %v2094_v12, 0.0  ;;  %v2097_v41 = vadd.f32 %v1684_v38, %v65_v37  ;;  %v532_v42 = vpop.f32.mrb[3].mxu1  ;;  %v888_v43 = vpop.f32.mrb[3].mxu0 }
 0x1a2   :  { %v898_v49 = vmax.f32 %v2096_v34, 0.0  ;;  %v2099_v51 = vadd.f32 %v532_v42, %v60_v22 }
 0x1a3   :  { %v925_v3 = vand.u32 4294901760, %v899_v40  ;;  %v2098_v57 = vadd.f32 %v2097_v41, %v1798_v39 }
 0x1a4   :  { %v922_v58 = vand.u32 4294901760, %v898_v49  ;;  %v2100_v9 = vadd.f32 %v2099_v51, %v888_v43 }
 0x1a5   :  { %v1009_v10 = vsub.f32 %v899_v40, %v925_v3  ;;  %v901_v11 = vmax.f32 %v2098_v57, 0.0 }
 0x1a6   :  { %v2058_v13 = vpack.c.bf16 %v925_v3, %v922_v58  ;;  %v1002_v14 = vsub.f32 %v898_v49, %v922_v58  ;;  %v900_v17 = vmax.f32 %v2100_v9, 0.0 }
 0x1a7   :  { %v1010_v52 = vand.u32 4294901760, %v1009_v10  ;;  %v919_v53 = vsel %vm917_vm3, %v901_v11, 0 }
 0x1a8   :  { %v1003_v21 = vand.u32 4294901760, %v1002_v14  ;;  %v931_v23 = vand.u32 4294901760, %v919_v53  ;;  %v928_v24 = vand.u32 4294901760, %v900_v17  ;;  %2059 = vmatpush3.bf16.msra.mxu0 %v2058_v13  ;;  %2077 = vmatpush3.bf16.msra.mxu1 %v2058_v13  ;;  %v2070_v27 = vpack.c.bf16 %v1009_v10, %v1002_v14 }
 0x1a9   :  { %v1011_v28 = vsub.f32 %v1009_v10, %v1010_v52  ;;  %2060 = vmatprep.subr.bf16.mxu0 %v2159_v15  ;;  %2078 = vmatprep.subr.bf16.mxu1 %v2159_v15 }
 0x1aa   :  { %v1004_v60 = vsub.f32 %v1002_v14, %v1003_v21  ;;  %v1023_v61 = vsub.f32 %v919_v53, %v931_v23  ;;  %v2061_v30 = vpack.c.bf16 %v931_v23, %v928_v24  ;;  %v1016_v32 = vsub.f32 %v900_v17, %v928_v24 }
 0x1ab   :  { %v1012_v33 = vand.u32 4294901760, %v1011_v28  ;;  %v2082_v36 = vpack.c.bf16 %v1010_v52, %v1003_v21 }
 0x1ac   :  { %v1005_v45 = vand.u32 4294901760, %v1004_v60  ;;  %v1024_v4 = vand.u32 4294901760, %v1023_v61  ;;  %v1017_v5 = vand.u32 4294901760, %v1016_v32  ;;  %2062 = vmatpush3.bf16.msra.mxu0 %v2061_v30  ;;  %2080 = vmatpush3.bf16.msra.mxu1 %v2061_v30  ;;  %v2073_v54 = vpack.c.bf16 %v1023_v61, %v1016_v32 }
 0x1ad   :  { %2063 = vmatprep.subr.bf16.mxu0 %v2159_v15  ;;  %2081 = vmatprep.subr.bf16.mxu1 %v2159_v15 }
 0x1ae   :  { %v1025_v55 = vsub.f32 %v1023_v61, %v1024_v4  ;;  %v1018_v46 = vsub.f32 %v1016_v32, %v1017_v5  ;;  %v2064_v47 = vpack.c.bf16 %v1012_v33, %v1005_v45  ;;  %v2085_v48 = vpack.c.bf16 %v1024_v4, %v1017_v5 }
 0x1af   :  { %1808 = vmatmul.mubr.f32.vlgmr.msra.gmra.mrb[4].mxu0 %v994_v35  ;;  %1841 = vmatmul.mubr.f32.vlgmr.msra.gmra.mrb[4].mxu1 %v992_v8 }
 0x1b0   :  { %v1026_v50 = vand.u32 4294901760, %v1025_v55  ;;  %v1019_v18 = vand.u32 4294901760, %v1018_v46  ;;  %2065 = vmatpush3.bf16.msra.mxu0 %v2064_v47  ;;  %2083 = vmatpush3.bf16.msra.mxu1 %v2082_v36 }
 0x1b1   :  { %2066 = vmatprep.subr.bf16.mxu0 %v2159_v15  ;;  %2084 = vmatprep.subr.bf16.mxu1 %v2159_v15 }
 0x1b2   :  { %v2067_v19 = vpack.c.bf16 %v1026_v50, %v1019_v18  ;;  %1818 = vmatprep.mubr.msk.f32.mxu0 %vm2160_vm1, %v2161_v16  ;;  %1851 = vmatprep.mubr.msk.f32.mxu1 %vm2160_vm1, %v2161_v16 }
 0x1b4   :  { %2068 = vmatpush3.bf16.msra.mxu0 %v2067_v19  ;;  %2086 = vmatpush3.bf16.msra.mxu1 %v2085_v48 }
 0x1b5   :  { %2069 = vmatprep.subr.bf16.mxu0 %v2159_v15  ;;  %2087 = vmatprep.subr.bf16.mxu1 %v2159_v15 }
 0x1b7   :  { %1819 = vmatmul.mubr.f32.vlgmr.msra.gmra.mrb[4].mxu0 %v2533_v59  ;;  %1852 = vmatmul.mubr.f32.vlgmr.msra.gmra.mrb[4].mxu1 %v2533_v59 }
 0x1b8   :  { %2071 = vmatpush3.bf16.msra.mxu0 %v2070_v27  ;;  %2089 = vmatpush3.bf16.msra.mxu1 %v2058_v13 }
 0x1b9   :  { %2072 = vmatprep.subr.bf16.mxu0 %v2159_v15  ;;  %2090 = vmatprep.subr.bf16.mxu1 %v2159_v15 }
 0x1ba   :  { %1829 = vmatprep.mubr.msk.f32.mxu0 %vm2160_vm1, %v2161_v16  ;;  %1862 = vmatprep.mubr.msk.f32.mxu1 %vm2160_vm1, %v2161_v16 }
 0x1bc   :  { %2074 = vmatpush3.bf16.msra.mxu0 %v2073_v54  ;;  %2092 = vmatpush3.bf16.msra.mxu1 %v2061_v30 }
 0x1bf   :  { %1830 = vmatmul.mubr.f32.vlgmr.msra.gmra.mrb[4].mxu0 %v2536_v31  ;;  %1863 = vmatmul.mubr.f32.vlgmr.msra.gmra.mrb[4].mxu1 %v2533_v59 }
 0x292   :  { %v1167_v37 = vpop.f32.mrb[4].mxu0  ;;  %v1402_v44 = vpop.f32.mrb[4].mxu1 }
 0x293   :  { %v2101_v15 = vadd.f32 %v1167_v37, %v912_v29  ;;  %v1831_v62 = vpop.f32.mrb[5].mxu0  ;;  %v1864_v63 = vpop.f32.mrb[5].mxu1 }
 0x295   :  { %v2102_v0 = vadd.f32 %v2101_v15, %v1402_v44 }
 0x297   :  { %1406 = vst [vmem:[#allocation3] sm:$0x1] %v2102_v0 }
 0x298   :  { %2145 = shalt.err (!%p2142_p4)
}
 0x299   :  { %s2146_s20 = scalar_lea.hbm %s2579_s5, 16 }
 0x29a   :  { %p2147_p5 = scmp.ne.s32.totalorder %s2579_s5, %s2146_s20  ;;  %p2150_p6 = scmp.lt.u32.totalorder %s2146_s20, %s2579_s5 }
 0x29c   :  { %p2152_p7 = pnand %p2150_p6, %p2147_p5 }
 0x29e   :  { %2155 = shalt.err (!%p2152_p7)
}
 0x29f   :  { %1416 = dma.vmem_to_hbm [thread:$0]  %s1414_s15, 16, %s2579_s5, [#allocation4]  }
 0x2a0   :  { %2156 = dma.done.wait [#allocation4], 16  }
 0x2a1   :  { %2157 = vsyncadd [#allocation4], 4294967280 }
 0x2a2   :  { %1420 = vsyncpa [#allocation4], 1 }

</bundles_post_ra>
